<compile_context>
chip_gen: v7x
topology: tpu7x:2x2x1
jax: 0.10.0
libtpu: 0.0.40
codegen_flags: <defaults>
</compile_context>

<pallas_src>
import functools
import math

import jax
import jax.numpy as jnp
from jax.experimental import pallas as pl
from jax.experimental.pallas import tpu as pltpu


# ---------------------------------------------------------------------------
# Kernel: one (batch-block, head-group) grid step.
# ---------------------------------------------------------------------------
def _mha_group_kernel(q_ref, k_ref,
                      wq_ref, wk_ref, wv_ref, wo_ref,
                      bq_ref, bk_ref, bv_ref, bo_ref,
                      o_ref, *, head_dim):
    g = pl.program_id(1)

    bt, lq, e_in = q_ref.shape
    _, lk, _ = k_ref.shape
    hd = wq_ref.shape[-1]              # Hb * Dh (this group's projection width)
    dh = head_dim
    hb = hd // dh

    # Flatten batch rows -> tall M dim for the projection GEMMs (bf16 operands).
    xq = q_ref[...].reshape(bt * lq, e_in)
    xk = k_ref[...].reshape(bt * lk, e_in)

    # Weights are fully VMEM-resident; pick this group's slab by leading-dim index.
    wq = wq_ref[g]                     # (E, Hb*Dh) bf16, 1/sqrt(Dh) folded in
    wk = wk_ref[g]
    wv = wv_ref[g]
    wo = wo_ref[g]                     # (Hb*Dh, E_pad) bf16

    # Wide projections for the whole head group; f32 accumulate + f32 bias,
    # then back to bf16 for the attention matmuls.
    qg = (jnp.dot(xq, wq, preferred_element_type=jnp.float32)
          + bq_ref[g]).astype(jnp.bfloat16)                     # (Bt*Lq, Hb*Dh)
    kg = (jnp.dot(xk, wk, preferred_element_type=jnp.float32)
          + bk_ref[g]).astype(jnp.bfloat16)                     # (Bt*Lk, Hb*Dh)
    vg = (jnp.dot(xk, wv, preferred_element_type=jnp.float32)
          + bv_ref[g]).astype(jnp.bfloat16)                     # (Bt*Lk, Hb*Dh)

    # Per-head attention within the group (softmax kept in f32; static slices only).
    ctx_parts = []
    for j in range(hb):
        sl = slice(j * dh, (j + 1) * dh)
        qh = qg[:, sl].reshape(bt, lq, dh)
        kh = kg[:, sl].reshape(bt, lk, dh)
        vh = vg[:, sl].reshape(bt, lk, dh)

        s = jnp.einsum('bqd,bkd->bqk', qh, kh,
                       preferred_element_type=jnp.float32)      # (Bt, Lq, Lk) f32
        m = jnp.max(s, axis=-1, keepdims=True)
        p = jnp.exp(s - m)
        denom = jnp.sum(p, axis=-1, keepdims=True)
        p = p * pl.reciprocal(denom, approx=True)               # EUP reciprocal slot

        ctx = jnp.einsum('bqk,bkd->bqd', p.astype(jnp.bfloat16), vh,
                         preferred_element_type=jnp.float32)    # (Bt, Lq, Dh) f32
        ctx_parts.append(ctx.reshape(bt * lq, dh).astype(jnp.bfloat16))

    ctx_cat = ctx_parts[0] if hb == 1 else jnp.concatenate(ctx_parts, axis=-1)

    # Wide (K = Hb*Dh) output-projection slice for this group.
    partial = jnp.dot(ctx_cat, wo, preferred_element_type=jnp.float32)
    partial = partial.reshape(bt, lq, -1)                        # (Bt, Lq, E_pad) f32

    # The f32 output block is resident across the head-group axis: use it directly
    # as the cross-group accumulator (no separate scratch). bo is added once at g==0.
    @pl.when(g == 0)
    def _():
        o_ref[...] = jnp.broadcast_to(bo_ref[...], o_ref.shape).astype(o_ref.dtype)

    o_ref[...] += partial.astype(o_ref.dtype)


# ---------------------------------------------------------------------------
# Host-side heuristics.
# ---------------------------------------------------------------------------
def _vmem_capacity_bytes():
    try:
        return int(pltpu.get_tpu_info().vmem_capacity_bytes)
    except Exception:
        return 64 << 20        # conservative fallback (v7x per-TensorCore VMEM)


def _pick_head_group(num_heads, head_dim, target_width=256):
    """Smallest divisor Hb of H with Hb*Dh >= target_width (falls back to H)."""
    for hb in range(1, num_heads + 1):
        if num_heads % hb == 0 and hb * head_dim >= target_width:
            return hb
    return num_heads


def _pick_batch_block(B, Lq, Lk, E, E_pad, group_width, budget_bytes):
    """Largest divisor of B whose per-step working set fits the VMEM budget.
    No '>=2 parallel batch steps' reservation: v5e/v6e have a single TensorCore,
    and on v7x feeding the second core is better done with an Lq-parallel axis
    (see TODO) than by collapsing the matmul M dimension."""
    weight_bytes = 2 * 2 * (3 * E * E + E * E_pad)            # resident bf16 weights (x2 bufs)
    best = 1
    for bt in range(1, B + 1):
        if B % bt:
            continue
        if bt > 1 and (Lq % 8 or Lk % 8):
            continue                                          # keep in-kernel reshapes tile-aligned
        act = 2 * 2 * bt * (Lq + Lk) * E                      # double-buffered bf16 q/k tiles
        outb = 2 * 4 * bt * Lq * E_pad                        # f32 output block
        inter = 4 * bt * ((Lq + 2 * Lk) * group_width         # qg / kg / vg
                          + 2 * Lq * Lk                       # live score tiles
                          + Lq * group_width + Lq * E_pad)    # ctx concat + partial
        if weight_bytes + act + outb + inter <= budget_bytes:
            best = bt
    return best


# ---------------------------------------------------------------------------
# Host wrapper.
# ---------------------------------------------------------------------------
def cross_attention_pallas(query, key, params, num_heads):
    """query: (B, Lq, E), key: (B, Lk, E). Returns (B, Lq, E) float32."""
    B, Lq, E = query.shape
    _, Lk, _ = key.shape
    assert E % num_heads == 0
    H = num_heads
    Dh = E // H
    scale = 1.0 / math.sqrt(Dh)

    E_pad = ((E + 127) // 128) * 128          # lane-dense output stores
    Hb = _pick_head_group(H, Dh)              # heads per grid step (wide GEMMs)
    G = H // Hb
    HD = Hb * Dh

    # ---- host-side parameter prep: transpose, head-group split, bf16 cast ----
    wq_t = (params["wq"].T * scale).reshape(E, G, HD).transpose(1, 0, 2)  # (G, E, HD)
    wk_t = params["wk"].T.reshape(E, G, HD).transpose(1, 0, 2)            # (G, E, HD)
    wv_t = params["wv"].T.reshape(E, G, HD).transpose(1, 0, 2)            # (G, E, HD)
    wo_t = params["wo"].T.reshape(G, HD, E)                               # (G, HD, E)

    bq_g = (params["bq"] * scale).reshape(G, 1, HD).astype(jnp.float32)
    bk_g = params["bk"].reshape(G, 1, HD).astype(jnp.float32)
    bv_g = params["bv"].reshape(G, 1, HD).astype(jnp.float32)
    bo = params["bo"].reshape(1, 1, E).astype(jnp.float32)

    if E_pad != E:
        wo_t = jnp.pad(wo_t, ((0, 0), (0, 0), (0, E_pad - E)))
        bo = jnp.pad(bo, ((0, 0), (0, 0), (0, E_pad - E)))

    wq_g = wq_t.astype(jnp.bfloat16)
    wk_g = wk_t.astype(jnp.bfloat16)
    wv_g = wv_t.astype(jnp.bfloat16)
    wo_g = wo_t.astype(jnp.bfloat16)

    q_bf = query.astype(jnp.bfloat16)
    k_bf = key.astype(jnp.bfloat16)

    # ---- generation-aware VMEM budget ----
    vmem_cap = _vmem_capacity_bytes()
    vmem_limit = min(int(vmem_cap * 0.75), 112 << 20)
    Bt = _pick_batch_block(B, Lq, Lk, E, E_pad, HD,
                           budget_bytes=int(vmem_limit * 0.6))
    grid = (B // Bt, G)

    flops = 2 * B * (Lq * E * E + 2 * Lk * E * E          # q / k / v projections
                     + 2 * H * Lq * Lk * Dh               # scores + p @ v
                     + Lq * E * E_pad)                    # output projection
    transcendentals = B * H * Lq * Lk                     # exp
    bytes_accessed = (2 * B * (Lq + Lk) * E               # bf16 activations in
                      + 4 * B * Lq * E_pad                # f32 out
                      + 2 * (3 * E * E + E * E_pad)       # bf16 weights (fetched once)
                      + 4 * (3 * E + E_pad))              # biases

    kernel = functools.partial(_mha_group_kernel, head_dim=Dh)

    out = pl.pallas_call(
        kernel,
        out_shape=jax.ShapeDtypeStruct((B, Lq, E_pad), jnp.float32),
        grid_spec=pltpu.PrefetchScalarGridSpec(
            num_scalar_prefetch=0,
            grid=grid,
            in_specs=[
                pl.BlockSpec((Bt, Lq, E), lambda b, g: (b, 0, 0)),      # query tile (bf16)
                pl.BlockSpec((Bt, Lk, E), lambda b, g: (b, 0, 0)),      # key tile (bf16)
                pl.BlockSpec((G, E, HD), lambda b, g: (0, 0, 0)),       # Wq (resident)
                pl.BlockSpec((G, E, HD), lambda b, g: (0, 0, 0)),       # Wk (resident)
                pl.BlockSpec((G, E, HD), lambda b, g: (0, 0, 0)),       # Wv (resident)
                pl.BlockSpec((G, HD, E_pad), lambda b, g: (0, 0, 0)),   # Wo (resident)
                pl.BlockSpec((G, 1, HD), lambda b, g: (0, 0, 0)),       # bq
                pl.BlockSpec((G, 1, HD), lambda b, g: (0, 0, 0)),       # bk
                pl.BlockSpec((G, 1, HD), lambda b, g: (0, 0, 0)),       # bv
                pl.BlockSpec((1, 1, E_pad), lambda b, g: (0, 0, 0)),    # bo
            ],
            out_specs=pl.BlockSpec((Bt, Lq, E_pad), lambda b, g: (b, 0, 0)),
        ),
        compiler_params=pltpu.CompilerParams(
            dimension_semantics=("parallel", "arbitrary"),
            vmem_limit_bytes=vmem_limit),
        cost_estimate=pl.CostEstimate(flops=flops,
                                      transcendentals=transcendentals,
                                      bytes_accessed=bytes_accessed),
    )(q_bf, k_bf, wq_g, wk_g, wv_g, wo_g, bq_g, bk_g, bv_g, bo)

    return out[..., :E] if E_pad != E else out


# ---------------------------------------------------------------------------
# Pure-JAX reference (mirrors torch.nn.MultiheadAttention forward, f32).
# ---------------------------------------------------------------------------
def cross_attention_ref(query, key, params, num_heads):
    B, Lq, E = query.shape
    _, Lk, _ = key.shape
    head_dim = E // num_heads

    q = query @ params["wq"].T + params["bq"]
    k = key @ params["wk"].T + params["bk"]
    v = key @ params["wv"].T + params["bv"]

    def split_heads(x, L):
        return x.reshape(B, L, num_heads, head_dim).transpose(0, 2, 1, 3)

    qh, kh, vh = split_heads(q, Lq), split_heads(k, Lk), split_heads(v, Lk)
    s = jnp.einsum("bhqd,bhkd->bhqk", qh, kh) / math.sqrt(head_dim)
    p = jax.nn.softmax(s, axis=-1)
    ctx = jnp.einsum("bhqk,bhkd->bhqd", p, vh)
    ctx = ctx.transpose(0, 2, 1, 3).reshape(B, Lq, E)
    return ctx @ params["wo"].T + params["bo"]


def init_params(key, embed_dim):
    """Synthetic init matching nn.MultiheadAttention param shapes (in_proj split
    into Wq/Wk/Wv + biases, out_proj weight + bias). Non-zero biases so the
    bias path is actually exercised."""
    keys = jax.random.split(key, 8)
    bound = 1.0 / math.sqrt(embed_dim)
    u = lambda k, shape: jax.random.uniform(k, shape, jnp.float32, -bound, bound)
    return {
        "wq": u(keys[0], (embed_dim, embed_dim)),
        "wk": u(keys[1], (embed_dim, embed_dim)),
        "wv": u(keys[2], (embed_dim, embed_dim)),
        "wo": u(keys[3], (embed_dim, embed_dim)),
        "bq": u(keys[4], (embed_dim,)),
        "bk": u(keys[5], (embed_dim,)),
        "bv": u(keys[6], (embed_dim,)),
        "bo": u(keys[7], (embed_dim,)),
    }


if __name__ == "__main__":
    B, Lq, Lk, E, H = 2, 8, 8, 32, 4

    root = jax.random.PRNGKey(0)
    kq, kk, kp = jax.random.split(root, 3)
    query = jax.random.normal(kq, (B, Lq, E), jnp.float32)
    key_arr = jax.random.normal(kk, (B, Lk, E), jnp.float32)
    params = init_params(kp, E)

    out = cross_attention_pallas(query, key_arr, params, H)
    out = jax.block_until_ready(out)

    ref = cross_attention_ref(query, key_arr, params, H)
    assert out.shape == (B, Lq, E)
    # bf16 MXU operands (f32 softmax / accumulation) -> loosened tolerance vs the
    # pure-f32 reference, per the performance-review guidance.
    assert jnp.allclose(out, ref, atol=3e-2, rtol=3e-2), "mismatch vs reference"

    print("KERNEL_OK")
</pallas_src>

<mosaic_0001>
module attributes {stable_mosaic.version = 11 : i64} {
  func.func @_mha_group_kernel(%arg0: i32, %arg1: i32, %arg2: memref<2x8x32xbf16, #tpu.memory_space<vmem>>, %arg3: memref<2x8x32xbf16, #tpu.memory_space<vmem>>, %arg4: memref<1x32x32xbf16, #tpu.memory_space<vmem>>, %arg5: memref<1x32x32xbf16, #tpu.memory_space<vmem>>, %arg6: memref<1x32x32xbf16, #tpu.memory_space<vmem>>, %arg7: memref<1x32x128xbf16, #tpu.memory_space<vmem>>, %arg8: memref<1x1x32xf32, #tpu.memory_space<vmem>>, %arg9: memref<1x1x32xf32, #tpu.memory_space<vmem>>, %arg10: memref<1x1x32xf32, #tpu.memory_space<vmem>>, %arg11: memref<1x1x128xf32, #tpu.memory_space<vmem>>, %arg12: memref<2x8x128xf32, #tpu.memory_space<vmem>>) attributes {dimension_semantics = [#tpu.dimension_semantics<parallel>, #tpu.dimension_semantics<arbitrary>], iteration_bounds = array<i64: 1, 1>, scalar_prefetch = 0 : i64, scratch_operands = 0 : i64, tpu.core_type = #tpu.core_type<tc>, window_params = [{transform_indices = @transform_0, window_bounds = array<i64: 2, 8, 32>}, {transform_indices = @transform_1, window_bounds = array<i64: 2, 8, 32>}, {pipeline_mode = #tpu.pipeline_mode<synchronous>, transform_indices = @transform_2, window_bounds = array<i64: 1, 32, 32>}, {pipeline_mode = #tpu.pipeline_mode<synchronous>, transform_indices = @transform_3, window_bounds = array<i64: 1, 32, 32>}, {pipeline_mode = #tpu.pipeline_mode<synchronous>, transform_indices = @transform_4, window_bounds = array<i64: 1, 32, 32>}, {pipeline_mode = #tpu.pipeline_mode<synchronous>, transform_indices = @transform_5, window_bounds = array<i64: 1, 32, 128>}, {pipeline_mode = #tpu.pipeline_mode<synchronous>, transform_indices = @transform_6, window_bounds = array<i64: 1, 1, 32>}, {pipeline_mode = #tpu.pipeline_mode<synchronous>, transform_indices = @transform_7, window_bounds = array<i64: 1, 1, 32>}, {pipeline_mode = #tpu.pipeline_mode<synchronous>, transform_indices = @transform_8, window_bounds = array<i64: 1, 1, 32>}, {pipeline_mode = #tpu.pipeline_mode<synchronous>, transform_indices = @transform_9, window_bounds = array<i64: 1, 1, 128>}, {transform_indices = @transform_10, window_bounds = array<i64: 2, 8, 128>}]} {
    %c0 = arith.constant 0 : index
    %c0_0 = arith.constant 0 : index
    %c0_1 = arith.constant 0 : index
    %0 = vector.load %arg2[%c0, %c0_0, %c0_1] : memref<2x8x32xbf16, #tpu.memory_space<vmem>>, vector<2x8x32xbf16>
    %1 = vector.shape_cast %0 : vector<2x8x32xbf16> to vector<16x32xbf16>
    %c0_2 = arith.constant 0 : index
    %c0_3 = arith.constant 0 : index
    %c0_4 = arith.constant 0 : index
    %2 = vector.load %arg3[%c0_2, %c0_3, %c0_4] : memref<2x8x32xbf16, #tpu.memory_space<vmem>>, vector<2x8x32xbf16>
    %3 = vector.shape_cast %2 : vector<2x8x32xbf16> to vector<16x32xbf16>
    %4 = arith.index_cast %arg1 : i32 to index
    %c0_5 = arith.constant 0 : index
    %c0_6 = arith.constant 0 : index
    %5 = vector.load %arg4[%4, %c0_5, %c0_6] : memref<1x32x32xbf16, #tpu.memory_space<vmem>>, vector<1x32x32xbf16>
    %6 = vector.shape_cast %5 : vector<1x32x32xbf16> to vector<32x32xbf16>
    %7 = arith.index_cast %arg1 : i32 to index
    %c0_7 = arith.constant 0 : index
    %c0_8 = arith.constant 0 : index
    %8 = vector.load %arg5[%7, %c0_7, %c0_8] : memref<1x32x32xbf16, #tpu.memory_space<vmem>>, vector<1x32x32xbf16>
    %9 = vector.shape_cast %8 : vector<1x32x32xbf16> to vector<32x32xbf16>
    %10 = arith.index_cast %arg1 : i32 to index
    %c0_9 = arith.constant 0 : index
    %c0_10 = arith.constant 0 : index
    %11 = vector.load %arg6[%10, %c0_9, %c0_10] : memref<1x32x32xbf16, #tpu.memory_space<vmem>>, vector<1x32x32xbf16>
    %12 = vector.shape_cast %11 : vector<1x32x32xbf16> to vector<32x32xbf16>
    %13 = arith.index_cast %arg1 : i32 to index
    %c0_11 = arith.constant 0 : index
    %c0_12 = arith.constant 0 : index
    %14 = vector.load %arg7[%13, %c0_11, %c0_12] : memref<1x32x128xbf16, #tpu.memory_space<vmem>>, vector<1x32x128xbf16>
    %15 = vector.shape_cast %14 : vector<1x32x128xbf16> to vector<32x128xbf16>
    %cst = arith.constant dense<0.000000e+00> : vector<16x32xf32>
    %16 = tpu.matmul %1, %6, %cst {dimension_numbers = #tpu.dot_dimension_numbers<[1], [0], [0], [1], [0, 0, 1, 1], [], []>} : vector<16x32xbf16>, vector<32x32xbf16>, vector<16x32xf32> -> vector<16x32xf32>
    %17 = arith.index_cast %arg1 : i32 to index
    %c0_13 = arith.constant 0 : index
    %c0_14 = arith.constant 0 : index
    %18 = vector.load %arg8[%17, %c0_13, %c0_14] : memref<1x1x32xf32, #tpu.memory_space<vmem>>, vector<1x1x32xf32>
    %19 = vector.shape_cast %18 : vector<1x1x32xf32> to vector<1x32xf32>
    %20 = vector.broadcast %19 : vector<1x32xf32> to vector<16x32xf32>
    %21 = arith.addf %16, %20 : vector<16x32xf32>
    %22 = arith.truncf %21 : vector<16x32xf32> to vector<16x32xbf16>
    %cst_15 = arith.constant dense<0.000000e+00> : vector<16x32xf32>
    %23 = tpu.matmul %3, %9, %cst_15 {dimension_numbers = #tpu.dot_dimension_numbers<[1], [0], [0], [1], [0, 0, 1, 1], [], []>} : vector<16x32xbf16>, vector<32x32xbf16>, vector<16x32xf32> -> vector<16x32xf32>
    %24 = arith.index_cast %arg1 : i32 to index
    %c0_16 = arith.constant 0 : index
    %c0_17 = arith.constant 0 : index
    %25 = vector.load %arg9[%24, %c0_16, %c0_17] : memref<1x1x32xf32, #tpu.memory_space<vmem>>, vector<1x1x32xf32>
    %26 = vector.shape_cast %25 : vector<1x1x32xf32> to vector<1x32xf32>
    %27 = vector.broadcast %26 : vector<1x32xf32> to vector<16x32xf32>
    %28 = arith.addf %23, %27 : vector<16x32xf32>
    %29 = arith.truncf %28 : vector<16x32xf32> to vector<16x32xbf16>
    %cst_18 = arith.constant dense<0.000000e+00> : vector<16x32xf32>
    %30 = tpu.matmul %3, %12, %cst_18 {dimension_numbers = #tpu.dot_dimension_numbers<[1], [0], [0], [1], [0, 0, 1, 1], [], []>} : vector<16x32xbf16>, vector<32x32xbf16>, vector<16x32xf32> -> vector<16x32xf32>
    %31 = arith.index_cast %arg1 : i32 to index
    %c0_19 = arith.constant 0 : index
    %c0_20 = arith.constant 0 : index
    %32 = vector.load %arg10[%31, %c0_19, %c0_20] : memref<1x1x32xf32, #tpu.memory_space<vmem>>, vector<1x1x32xf32>
    %33 = vector.shape_cast %32 : vector<1x1x32xf32> to vector<1x32xf32>
    %34 = vector.broadcast %33 : vector<1x32xf32> to vector<16x32xf32>
    %35 = arith.addf %30, %34 : vector<16x32xf32>
    %36 = arith.truncf %35 : vector<16x32xf32> to vector<16x32xbf16>
    %37 = vector.extract_strided_slice %22 {offsets = [0, 0], sizes = [16, 8], strides = [1, 1]} : vector<16x32xbf16> to vector<16x8xbf16>
    %38 = vector.shape_cast %37 : vector<16x8xbf16> to vector<2x8x8xbf16>
    %39 = vector.extract_strided_slice %29 {offsets = [0, 0], sizes = [16, 8], strides = [1, 1]} : vector<16x32xbf16> to vector<16x8xbf16>
    %40 = vector.shape_cast %39 : vector<16x8xbf16> to vector<2x8x8xbf16>
    %41 = vector.extract_strided_slice %36 {offsets = [0, 0], sizes = [16, 8], strides = [1, 1]} : vector<16x32xbf16> to vector<16x8xbf16>
    %42 = vector.shape_cast %41 : vector<16x8xbf16> to vector<2x8x8xbf16>
    "tpu.trace_start"() <{level = 10 : i32, message = "bqd,bkd->bqk"}> : () -> ()
    %cst_21 = arith.constant dense<0.000000e+00> : vector<2x8x8xf32>
    %43 = tpu.matmul %38, %40, %cst_21 {dimension_numbers = #tpu.dot_dimension_numbers<[2], [2], [1], [1], [0, 0, 0, 1, 1, 1], [0], [0]>} : vector<2x8x8xbf16>, vector<2x8x8xbf16>, vector<2x8x8xf32> -> vector<2x8x8xf32>
    "tpu.trace_stop"() : () -> ()
    %cst_22 = arith.constant dense<0xFF800000> : vector<2x8xf32>
    %44 = vector.multi_reduction <maximumf>, %43, %cst_22 [2] : vector<2x8x8xf32> to vector<2x8xf32>
    %45 = vector.shape_cast %44 : vector<2x8xf32> to vector<2x8x1xf32>
    %46 = vector.broadcast %45 : vector<2x8x1xf32> to vector<2x8x8xf32>
    %47 = arith.subf %43, %46 : vector<2x8x8xf32>
    %48 = math.exp %47 : vector<2x8x8xf32>
    %cst_23 = arith.constant dense<0.000000e+00> : vector<2x8xf32>
    %49 = vector.multi_reduction <add>, %48, %cst_23 [2] : vector<2x8x8xf32> to vector<2x8xf32>
    %50 = vector.shape_cast %49 : vector<2x8xf32> to vector<2x8x1xf32>
    %51 = tpu.reciprocal %50 {approx = true} : vector<2x8x1xf32> -> vector<2x8x1xf32>
    %52 = vector.broadcast %51 : vector<2x8x1xf32> to vector<2x8x8xf32>
    %53 = arith.mulf %48, %52 : vector<2x8x8xf32>
    %54 = arith.truncf %53 : vector<2x8x8xf32> to vector<2x8x8xbf16>
    "tpu.trace_start"() <{level = 10 : i32, message = "bqk,bkd->bqd"}> : () -> ()
    %cst_24 = arith.constant dense<0.000000e+00> : vector<2x8x8xf32>
    %55 = tpu.matmul %54, %42, %cst_24 {dimension_numbers = #tpu.dot_dimension_numbers<[2], [1], [1], [2], [0, 0, 0, 1, 1, 2], [0], [0]>} : vector<2x8x8xbf16>, vector<2x8x8xbf16>, vector<2x8x8xf32> -> vector<2x8x8xf32>
    "tpu.trace_stop"() : () -> ()
    %56 = vector.shape_cast %55 : vector<2x8x8xf32> to vector<16x8xf32>
    %57 = arith.truncf %56 : vector<16x8xf32> to vector<16x8xbf16>
    %58 = vector.extract_strided_slice %22 {offsets = [0, 8], sizes = [16, 8], strides = [1, 1]} : vector<16x32xbf16> to vector<16x8xbf16>
    %59 = vector.shape_cast %58 : vector<16x8xbf16> to vector<2x8x8xbf16>
    %60 = vector.extract_strided_slice %29 {offsets = [0, 8], sizes = [16, 8], strides = [1, 1]} : vector<16x32xbf16> to vector<16x8xbf16>
    %61 = vector.shape_cast %60 : vector<16x8xbf16> to vector<2x8x8xbf16>
    %62 = vector.extract_strided_slice %36 {offsets = [0, 8], sizes = [16, 8], strides = [1, 1]} : vector<16x32xbf16> to vector<16x8xbf16>
    %63 = vector.shape_cast %62 : vector<16x8xbf16> to vector<2x8x8xbf16>
    "tpu.trace_start"() <{level = 10 : i32, message = "bqd,bkd->bqk"}> : () -> ()
    %cst_25 = arith.constant dense<0.000000e+00> : vector<2x8x8xf32>
    %64 = tpu.matmul %59, %61, %cst_25 {dimension_numbers = #tpu.dot_dimension_numbers<[2], [2], [1], [1], [0, 0, 0, 1, 1, 1], [0], [0]>} : vector<2x8x8xbf16>, vector<2x8x8xbf16>, vector<2x8x8xf32> -> vector<2x8x8xf32>
    "tpu.trace_stop"() : () -> ()
    %cst_26 = arith.constant dense<0xFF800000> : vector<2x8xf32>
    %65 = vector.multi_reduction <maximumf>, %64, %cst_26 [2] : vector<2x8x8xf32> to vector<2x8xf32>
    %66 = vector.shape_cast %65 : vector<2x8xf32> to vector<2x8x1xf32>
    %67 = vector.broadcast %66 : vector<2x8x1xf32> to vector<2x8x8xf32>
    %68 = arith.subf %64, %67 : vector<2x8x8xf32>
    %69 = math.exp %68 : vector<2x8x8xf32>
    %cst_27 = arith.constant dense<0.000000e+00> : vector<2x8xf32>
    %70 = vector.multi_reduction <add>, %69, %cst_27 [2] : vector<2x8x8xf32> to vector<2x8xf32>
    %71 = vector.shape_cast %70 : vector<2x8xf32> to vector<2x8x1xf32>
    %72 = tpu.reciprocal %71 {approx = true} : vector<2x8x1xf32> -> vector<2x8x1xf32>
    %73 = vector.broadcast %72 : vector<2x8x1xf32> to vector<2x8x8xf32>
    %74 = arith.mulf %69, %73 : vector<2x8x8xf32>
    %75 = arith.truncf %74 : vector<2x8x8xf32> to vector<2x8x8xbf16>
    "tpu.trace_start"() <{level = 10 : i32, message = "bqk,bkd->bqd"}> : () -> ()
    %cst_28 = arith.constant dense<0.000000e+00> : vector<2x8x8xf32>
    %76 = tpu.matmul %75, %63, %cst_28 {dimension_numbers = #tpu.dot_dimension_numbers<[2], [1], [1], [2], [0, 0, 0, 1, 1, 2], [0], [0]>} : vector<2x8x8xbf16>, vector<2x8x8xbf16>, vector<2x8x8xf32> -> vector<2x8x8xf32>
    "tpu.trace_stop"() : () -> ()
    %77 = vector.shape_cast %76 : vector<2x8x8xf32> to vector<16x8xf32>
    %78 = arith.truncf %77 : vector<16x8xf32> to vector<16x8xbf16>
    %79 = vector.extract_strided_slice %22 {offsets = [0, 16], sizes = [16, 8], strides = [1, 1]} : vector<16x32xbf16> to vector<16x8xbf16>
    %80 = vector.shape_cast %79 : vector<16x8xbf16> to vector<2x8x8xbf16>
    %81 = vector.extract_strided_slice %29 {offsets = [0, 16], sizes = [16, 8], strides = [1, 1]} : vector<16x32xbf16> to vector<16x8xbf16>
    %82 = vector.shape_cast %81 : vector<16x8xbf16> to vector<2x8x8xbf16>
    %83 = vector.extract_strided_slice %36 {offsets = [0, 16], sizes = [16, 8], strides = [1, 1]} : vector<16x32xbf16> to vector<16x8xbf16>
    %84 = vector.shape_cast %83 : vector<16x8xbf16> to vector<2x8x8xbf16>
    "tpu.trace_start"() <{level = 10 : i32, message = "bqd,bkd->bqk"}> : () -> ()
    %cst_29 = arith.constant dense<0.000000e+00> : vector<2x8x8xf32>
    %85 = tpu.matmul %80, %82, %cst_29 {dimension_numbers = #tpu.dot_dimension_numbers<[2], [2], [1], [1], [0, 0, 0, 1, 1, 1], [0], [0]>} : vector<2x8x8xbf16>, vector<2x8x8xbf16>, vector<2x8x8xf32> -> vector<2x8x8xf32>
    "tpu.trace_stop"() : () -> ()
    %cst_30 = arith.constant dense<0xFF800000> : vector<2x8xf32>
    %86 = vector.multi_reduction <maximumf>, %85, %cst_30 [2] : vector<2x8x8xf32> to vector<2x8xf32>
    %87 = vector.shape_cast %86 : vector<2x8xf32> to vector<2x8x1xf32>
    %88 = vector.broadcast %87 : vector<2x8x1xf32> to vector<2x8x8xf32>
    %89 = arith.subf %85, %88 : vector<2x8x8xf32>
    %90 = math.exp %89 : vector<2x8x8xf32>
    %cst_31 = arith.constant dense<0.000000e+00> : vector<2x8xf32>
    %91 = vector.multi_reduction <add>, %90, %cst_31 [2] : vector<2x8x8xf32> to vector<2x8xf32>
    %92 = vector.shape_cast %91 : vector<2x8xf32> to vector<2x8x1xf32>
    %93 = tpu.reciprocal %92 {approx = true} : vector<2x8x1xf32> -> vector<2x8x1xf32>
    %94 = vector.broadcast %93 : vector<2x8x1xf32> to vector<2x8x8xf32>
    %95 = arith.mulf %90, %94 : vector<2x8x8xf32>
    %96 = arith.truncf %95 : vector<2x8x8xf32> to vector<2x8x8xbf16>
    "tpu.trace_start"() <{level = 10 : i32, message = "bqk,bkd->bqd"}> : () -> ()
    %cst_32 = arith.constant dense<0.000000e+00> : vector<2x8x8xf32>
    %97 = tpu.matmul %96, %84, %cst_32 {dimension_numbers = #tpu.dot_dimension_numbers<[2], [1], [1], [2], [0, 0, 0, 1, 1, 2], [0], [0]>} : vector<2x8x8xbf16>, vector<2x8x8xbf16>, vector<2x8x8xf32> -> vector<2x8x8xf32>
    "tpu.trace_stop"() : () -> ()
    %98 = vector.shape_cast %97 : vector<2x8x8xf32> to vector<16x8xf32>
    %99 = arith.truncf %98 : vector<16x8xf32> to vector<16x8xbf16>
    %100 = vector.extract_strided_slice %22 {offsets = [0, 24], sizes = [16, 8], strides = [1, 1]} : vector<16x32xbf16> to vector<16x8xbf16>
    %101 = vector.shape_cast %100 : vector<16x8xbf16> to vector<2x8x8xbf16>
    %102 = vector.extract_strided_slice %29 {offsets = [0, 24], sizes = [16, 8], strides = [1, 1]} : vector<16x32xbf16> to vector<16x8xbf16>
    %103 = vector.shape_cast %102 : vector<16x8xbf16> to vector<2x8x8xbf16>
    %104 = vector.extract_strided_slice %36 {offsets = [0, 24], sizes = [16, 8], strides = [1, 1]} : vector<16x32xbf16> to vector<16x8xbf16>
    %105 = vector.shape_cast %104 : vector<16x8xbf16> to vector<2x8x8xbf16>
    "tpu.trace_start"() <{level = 10 : i32, message = "bqd,bkd->bqk"}> : () -> ()
    %cst_33 = arith.constant dense<0.000000e+00> : vector<2x8x8xf32>
    %106 = tpu.matmul %101, %103, %cst_33 {dimension_numbers = #tpu.dot_dimension_numbers<[2], [2], [1], [1], [0, 0, 0, 1, 1, 1], [0], [0]>} : vector<2x8x8xbf16>, vector<2x8x8xbf16>, vector<2x8x8xf32> -> vector<2x8x8xf32>
    "tpu.trace_stop"() : () -> ()
    %cst_34 = arith.constant dense<0xFF800000> : vector<2x8xf32>
    %107 = vector.multi_reduction <maximumf>, %106, %cst_34 [2] : vector<2x8x8xf32> to vector<2x8xf32>
    %108 = vector.shape_cast %107 : vector<2x8xf32> to vector<2x8x1xf32>
    %109 = vector.broadcast %108 : vector<2x8x1xf32> to vector<2x8x8xf32>
    %110 = arith.subf %106, %109 : vector<2x8x8xf32>
    %111 = math.exp %110 : vector<2x8x8xf32>
    %cst_35 = arith.constant dense<0.000000e+00> : vector<2x8xf32>
    %112 = vector.multi_reduction <add>, %111, %cst_35 [2] : vector<2x8x8xf32> to vector<2x8xf32>
    %113 = vector.shape_cast %112 : vector<2x8xf32> to vector<2x8x1xf32>
    %114 = tpu.reciprocal %113 {approx = true} : vector<2x8x1xf32> -> vector<2x8x1xf32>
    %115 = vector.broadcast %114 : vector<2x8x1xf32> to vector<2x8x8xf32>
    %116 = arith.mulf %111, %115 : vector<2x8x8xf32>
    %117 = arith.truncf %116 : vector<2x8x8xf32> to vector<2x8x8xbf16>
    "tpu.trace_start"() <{level = 10 : i32, message = "bqk,bkd->bqd"}> : () -> ()
    %cst_36 = arith.constant dense<0.000000e+00> : vector<2x8x8xf32>
    %118 = tpu.matmul %117, %105, %cst_36 {dimension_numbers = #tpu.dot_dimension_numbers<[2], [1], [1], [2], [0, 0, 0, 1, 1, 2], [0], [0]>} : vector<2x8x8xbf16>, vector<2x8x8xbf16>, vector<2x8x8xf32> -> vector<2x8x8xf32>
    "tpu.trace_stop"() : () -> ()
    %119 = vector.shape_cast %118 : vector<2x8x8xf32> to vector<16x8xf32>
    %120 = arith.truncf %119 : vector<16x8xf32> to vector<16x8xbf16>
    %121 = tpu.concatenate %57, %78, %99, %120 in 1 : vector<16x8xbf16>, vector<16x8xbf16>, vector<16x8xbf16>, vector<16x8xbf16> -> vector<16x32xbf16>
    %cst_37 = arith.constant dense<0.000000e+00> : vector<16x128xf32>
    %122 = tpu.matmul %121, %15, %cst_37 {dimension_numbers = #tpu.dot_dimension_numbers<[1], [0], [0], [1], [0, 0, 1, 1], [], []>} : vector<16x32xbf16>, vector<32x128xbf16>, vector<16x128xf32> -> vector<16x128xf32>
    %123 = vector.shape_cast %122 : vector<16x128xf32> to vector<2x8x128xf32>
    %c0_i32 = arith.constant 0 : i32
    %124 = arith.cmpi eq, %arg1, %c0_i32 : i32
    %125 = arith.extui %124 : i1 to i32
    %c0_i32_38 = arith.constant 0 : i32
    %126 = arith.cmpi ne, %125, %c0_i32_38 : i32
    scf.if %126 {
      %c0_45 = arith.constant 0 : index
      %c0_46 = arith.constant 0 : index
      %c0_47 = arith.constant 0 : index
      %130 = vector.load %arg11[%c0_45, %c0_46, %c0_47] : memref<1x1x128xf32, #tpu.memory_space<vmem>>, vector<1x1x128xf32>
      %131 = vector.shape_cast %130 : vector<1x1x128xf32> to vector<1x1x128xf32>
      %132 = vector.broadcast %131 : vector<1x1x128xf32> to vector<2x8x128xf32>
      %c0_48 = arith.constant 0 : index
      %c0_49 = arith.constant 0 : index
      %c0_50 = arith.constant 0 : index
      %133 = vector.load %arg12[%c0_48, %c0_49, %c0_50] : memref<2x8x128xf32, #tpu.memory_space<vmem>>, vector<2x8x128xf32>
      tpu.vector_store %arg12[%c0_48, %c0_49, %c0_50], %132 {strides = array<i32>} : memref<2x8x128xf32, #tpu.memory_space<vmem>>, vector<2x8x128xf32>,
    } else {
    }
    %c0_39 = arith.constant 0 : index
    %c0_40 = arith.constant 0 : index
    %c0_41 = arith.constant 0 : index
    %127 = vector.load %arg12[%c0_39, %c0_40, %c0_41] : memref<2x8x128xf32, #tpu.memory_space<vmem>>, vector<2x8x128xf32>
    %128 = arith.addf %127, %123 : vector<2x8x128xf32>
    %c0_42 = arith.constant 0 : index
    %c0_43 = arith.constant 0 : index
    %c0_44 = arith.constant 0 : index
    %129 = vector.load %arg12[%c0_42, %c0_43, %c0_44] : memref<2x8x128xf32, #tpu.memory_space<vmem>>, vector<2x8x128xf32>
    tpu.vector_store %arg12[%c0_42, %c0_43, %c0_44], %128 {strides = array<i32>} : memref<2x8x128xf32, #tpu.memory_space<vmem>>, vector<2x8x128xf32>,
    return
  }
  func.func @transform_0(%arg0: i32, %arg1: i32) -> (i32, i32, i32) {
    %c0_i32 = arith.constant 0 : i32
    %c0_i32_0 = arith.constant 0 : i32
    %c0_i32_1 = arith.constant 0 : i32
    return %arg0, %c0_i32, %c0_i32_0 : i32, i32, i32
  }
  func.func @transform_1(%arg0: i32, %arg1: i32) -> (i32, i32, i32) {
    %c0_i32 = arith.constant 0 : i32
    %c0_i32_0 = arith.constant 0 : i32
    %c0_i32_1 = arith.constant 0 : i32
    return %arg0, %c0_i32, %c0_i32_0 : i32, i32, i32
  }
  func.func @transform_2(%arg0: i32, %arg1: i32) -> (i32, i32, i32) {
    %c0_i32 = arith.constant 0 : i32
    %c0_i32_0 = arith.constant 0 : i32
    %c0_i32_1 = arith.constant 0 : i32
    %c0_i32_2 = arith.constant 0 : i32
    return %c0_i32, %c0_i32_0, %c0_i32_1 : i32, i32, i32
  }
  func.func @transform_3(%arg0: i32, %arg1: i32) -> (i32, i32, i32) {
    %c0_i32 = arith.constant 0 : i32
    %c0_i32_0 = arith.constant 0 : i32
    %c0_i32_1 = arith.constant 0 : i32
    %c0_i32_2 = arith.constant 0 : i32
    return %c0_i32, %c0_i32_0, %c0_i32_1 : i32, i32, i32
  }
  func.func @transform_4(%arg0: i32, %arg1: i32) -> (i32, i32, i32) {
    %c0_i32 = arith.constant 0 : i32
    %c0_i32_0 = arith.constant 0 : i32
    %c0_i32_1 = arith.constant 0 : i32
    %c0_i32_2 = arith.constant 0 : i32
    return %c0_i32, %c0_i32_0, %c0_i32_1 : i32, i32, i32
  }
  func.func @transform_5(%arg0: i32, %arg1: i32) -> (i32, i32, i32) {
    %c0_i32 = arith.constant 0 : i32
    %c0_i32_0 = arith.constant 0 : i32
    %c0_i32_1 = arith.constant 0 : i32
    %c0_i32_2 = arith.constant 0 : i32
    return %c0_i32, %c0_i32_0, %c0_i32_1 : i32, i32, i32
  }
  func.func @transform_6(%arg0: i32, %arg1: i32) -> (i32, i32, i32) {
    %c0_i32 = arith.constant 0 : i32
    %c0_i32_0 = arith.constant 0 : i32
    %c0_i32_1 = arith.constant 0 : i32
    %c0_i32_2 = arith.constant 0 : i32
    return %c0_i32, %c0_i32_0, %c0_i32_1 : i32, i32, i32
  }
  func.func @transform_7(%arg0: i32, %arg1: i32) -> (i32, i32, i32) {
    %c0_i32 = arith.constant 0 : i32
    %c0_i32_0 = arith.constant 0 : i32
    %c0_i32_1 = arith.constant 0 : i32
    %c0_i32_2 = arith.constant 0 : i32
    return %c0_i32, %c0_i32_0, %c0_i32_1 : i32, i32, i32
  }
  func.func @transform_8(%arg0: i32, %arg1: i32) -> (i32, i32, i32) {
    %c0_i32 = arith.constant 0 : i32
    %c0_i32_0 = arith.constant 0 : i32
    %c0_i32_1 = arith.constant 0 : i32
    %c0_i32_2 = arith.constant 0 : i32
    return %c0_i32, %c0_i32_0, %c0_i32_1 : i32, i32, i32
  }
  func.func @transform_9(%arg0: i32, %arg1: i32) -> (i32, i32, i32) {
    %c0_i32 = arith.constant 0 : i32
    %c0_i32_0 = arith.constant 0 : i32
    %c0_i32_1 = arith.constant 0 : i32
    %c0_i32_2 = arith.constant 0 : i32
    return %c0_i32, %c0_i32_0, %c0_i32_1 : i32, i32, i32
  }
  func.func @transform_10(%arg0: i32, %arg1: i32) -> (i32, i32, i32) {
    %c0_i32 = arith.constant 0 : i32
    %c0_i32_0 = arith.constant 0 : i32
    %c0_i32_1 = arith.constant 0 : i32
    return %arg0, %c0_i32, %c0_i32_0 : i32, i32, i32
  }
}

</mosaic_0001>

<bundles_post_ra>
// kernel: tpu_custom_call.1
= control target key start
LH: loop header
LB: loop body
LE: loop exit
PB: predicated region body
PF: predicated region fallthrough
CT: control target
= control target key end

     0   :  { %15 = vsyncpa [#allocation3], 0  ;;  %s2133_s0 = inlined_call_operand.hbm [shape: bf16[2,8,32], index: 0, kind: input, shape index: {}]   ;;  %s2134_s1 = inlined_call_operand.hbm [shape: bf16[2,8,32], index: 1, kind: input, shape index: {}]   ;;  %s2135_s2 = inlined_call_operand.hbm [shape: bf16[1,32,32], index: 2, kind: input, shape index: {}]   ;;  %s2136_s3 = inlined_call_operand.hbm [shape: bf16[1,32,32], index: 3, kind: input, shape index: {}]   ;;  %s2137_s4 = inlined_call_operand.hbm [shape: bf16[1,32,32], index: 4, kind: input, shape index: {}]   ;;  %s2138_s5 = inlined_call_operand.vmem [shape: bf16[1,32,128], index: 5, kind: input, shape index: {}]   ;;  %s2139_s6 = inlined_call_operand.vmem [shape: f32[1,1,32], index: 6, kind: input, shape index: {}]   ;;  %s2140_s7 = inlined_call_operand.vmem [shape: f32[1,1,32], index: 7, kind: input, shape index: {}]   ;;  %s2141_s8 = inlined_call_operand.vmem [shape: f32[1,1,32], index: 8, kind: input, shape index: {}]   ;;  %s2142_s9 = inlined_call_operand.vmem [shape: f32[1,1,128], index: 9, kind: input, shape index: {}]   ;;  %s2143_s10 = inlined_call_operand.hbm [shape: f32[2,8,128], index: 10, kind: output, shape index: {}]  }
   0x1   :  { %16 = vsyncpa [#allocation6], 0 }
   0x2   :  { %17 = vsyncpa [#allocation9], 0 }
   0x3   :  { %18 = vsyncpa [#allocation4], 0  ;;  %s1751_s13 = smov [#allocation5]   ;;  %s1752_s15 = smov [#allocation8]  }
   0x4   :  { %s36_s14 = sshll.u32 %s1751_s13, 4  ;;  %s60_s16 = sshll.u32 %s1752_s15, 4  ;;  %s37_s14 = int_to_ptr.vmem [resolvable:$true] %s36_s14  ;;  %s1823_s16 = int_to_ptr.vmem [resolvable:$true] %s60_s16 }
   0x5   :  { %s1611_s19 = scalar_lea.hbm %s2134_s1, 128 }
   0x6   :  { %p1612_p0 = scmp.ne.s32.totalorder %s2134_s1, %s1611_s19  ;;  %p1615_p1 = scmp.lt.u32.totalorder %s1611_s19, %s2134_s1 }
   0x8   :  { %p1617_p2 = pnand %p1615_p1, %p1612_p0 }
   0xa   :  { %1620 = shalt.err (!%p1617_p2)
}
   0xb   :  { %s1621_s24 = scalar_lea.vmem %s37_s14, 128  ;;  %p1626_p4 = scmp.lt.s32.totalorder %s37_s14, %s37_s14 }
   0xc   :  { %p1622_p3 = scmp.ne.s32.totalorder %s37_s14, %s1621_s24  ;;  %p1627_p5 = scmp.lt.s32.totalorder %s1621_s24, %s1621_s24 }
   0xe   :  { %p1628_p6 = por %p1627_p5, %p1626_p4 }
  0x10   :  { %p1629_p7 = pnand %p1628_p6, %p1622_p3 }
  0x12   :  { %1632 = shalt.err (!%p1629_p7)
}
  0x13   :  { %s1753_s25 = smov 64   ;;  %s1754_s26 = smov 4  }
  0x14   :  { %42 = dma.hbm_to_vmem [thread:$0]  %s2134_s1, 128, %s37_s14, [#allocation6], %s1753_s25, %s1753_s25, %s1754_s26  }
  0x15   :  { %s1633_s11 = scalar_lea.hbm %s2136_s3, 256 }
  0x16   :  { %p1634_p8 = scmp.ne.s32.totalorder %s2136_s3, %s1633_s11  ;;  %p1637_p9 = scmp.lt.u32.totalorder %s1633_s11, %s2136_s3 }
  0x18   :  { %p1639_p10 = pnand %p1637_p9, %p1634_p8 }
  0x1a   :  { %1642 = shalt.err (!%p1639_p10)
}
  0x1b   :  { %s1643_s18 = scalar_lea.vmem %s1823_s16, 256  ;;  %p1648_p12 = scmp.lt.s32.totalorder %s1823_s16, %s1823_s16 }
  0x1c   :  { %p1644_p11 = scmp.ne.s32.totalorder %s1823_s16, %s1643_s18  ;;  %p1649_p13 = scmp.lt.s32.totalorder %s1643_s18, %s1643_s18 }
  0x1e   :  { %p1650_p0 = por %p1649_p13, %p1648_p12 }
  0x20   :  { %p1651_p1 = pnand %p1650_p0, %p1644_p11 }
  0x22   :  { %1654 = shalt.err (!%p1651_p1)
}
  0x23   :  { %66 = dma.hbm_to_vmem [thread:$0]  %s2136_s3, 256, %s1823_s16, [#allocation9], %s1753_s25, %s1753_s25, %s1754_s26  }
  0x24   :  { %s1755_s19 = smov [#allocation2]   ;;  %s1756_s21 = smov [#allocation7]  }
  0x25   :  { %s24_s20 = sshll.u32 %s1755_s19, 4  ;;  %s48_s22 = sshll.u32 %s1756_s21, 4  ;;  %s25_s20 = int_to_ptr.vmem [resolvable:$true] %s24_s20  ;;  %s1860_s22 = int_to_ptr.vmem [resolvable:$true] %s48_s22 }
  0x26   :  { %s1655_s27 = scalar_lea.hbm %s2133_s0, 128 }
  0x27   :  { %p1656_p2 = scmp.ne.s32.totalorder %s2133_s0, %s1655_s27  ;;  %p1659_p3 = scmp.lt.u32.totalorder %s1655_s27, %s2133_s0 }
  0x29   :  { %p1661_p4 = pnand %p1659_p3, %p1656_p2 }
  0x2b   :  { %1664 = shalt.err (!%p1661_p4)
}
  0x2c   :  { %s1665_s3 = scalar_lea.vmem %s25_s20, 128  ;;  %p1670_p6 = scmp.lt.s32.totalorder %s25_s20, %s25_s20 }
  0x2d   :  { %p1666_p5 = scmp.ne.s32.totalorder %s25_s20, %s1665_s3  ;;  %p1671_p7 = scmp.lt.s32.totalorder %s1665_s3, %s1665_s3 }
  0x2f   :  { %p1672_p8 = por %p1671_p7, %p1670_p6 }
  0x31   :  { %p1673_p9 = pnand %p1672_p8, %p1666_p5 }
  0x33   :  { %1676 = shalt.err (!%p1673_p9)
}
  0x34   :  { %30 = dma.hbm_to_vmem [thread:$0]  %s2133_s0, 128, %s25_s20, [#allocation3], %s1753_s25, %s1753_s25, %s1754_s26  }
  0x35   :  { %s1677_s17 = scalar_lea.hbm %s2135_s2, 256 }
  0x36   :  { %p1678_p10 = scmp.ne.s32.totalorder %s2135_s2, %s1677_s17  ;;  %p1681_p11 = scmp.lt.u32.totalorder %s1677_s17, %s2135_s2 }
  0x38   :  { %p1683_p12 = pnand %p1681_p11, %p1678_p10 }
  0x3a   :  { %1686 = shalt.err (!%p1683_p12)
}
  0x3b   :  { %s1687_s21 = scalar_lea.vmem %s1860_s22, 256  ;;  %p1692_p0 = scmp.lt.s32.totalorder %s1860_s22, %s1860_s22 }
  0x3c   :  { %p1688_p13 = scmp.ne.s32.totalorder %s1860_s22, %s1687_s21  ;;  %p1693_p1 = scmp.lt.s32.totalorder %s1687_s21, %s1687_s21 }
  0x3e   :  { %p1694_p2 = por %p1693_p1, %p1692_p0 }
  0x40   :  { %p1695_p3 = pnand %p1694_p2, %p1688_p13 }
  0x42   :  { %1698 = shalt.err (!%p1695_p3)
}
  0x43   :  { %54 = dma.hbm_to_vmem [thread:$0]  %s2135_s2, 256, %s1860_s22, [#allocation6], %s1753_s25, %s1753_s25, %s1754_s26  }
  0x44   :  { %s1757_s23 = smov [#allocation10]   ;;  %s1699_s29 = scalar_lea.hbm %s2137_s4, 256 }
  0x45   :  { %s72_s24 = sshll.u32 %s1757_s23, 4  ;;  %p1700_p4 = scmp.ne.s32.totalorder %s2137_s4, %s1699_s29  ;;  %s73_s24 = int_to_ptr.vmem [resolvable:$true] %s72_s24 }
  0x46   :  { %p1703_p5 = scmp.lt.u32.totalorder %s1699_s29, %s2137_s4 }
  0x48   :  { %p1705_p6 = pnand %p1703_p5, %p1700_p4 }
  0x4a   :  { %1708 = shalt.err (!%p1705_p6)
}
  0x4b   :  { %s1709_s12 = scalar_lea.vmem %s73_s24, 256  ;;  %p1714_p8 = scmp.lt.s32.totalorder %s73_s24, %s73_s24 }
  0x4c   :  { %p1710_p7 = scmp.ne.s32.totalorder %s73_s24, %s1709_s12  ;;  %p1715_p9 = scmp.lt.s32.totalorder %s1709_s12, %s1709_s12 }
  0x4e   :  { %p1716_p10 = por %p1715_p9, %p1714_p8 }
  0x50   :  { %p1717_p11 = pnand %p1716_p10, %p1710_p7 }
  0x52   :  { %1720 = shalt.err (!%p1717_p11)
}
  0x53   :  { %78 = dma.hbm_to_vmem [thread:$0]  %s2137_s4, 256, %s73_s24, [#allocation9], %s1753_s25, %s1753_s25, %s1754_s26  }
  0x54   :  { %1743 = dma.done.wait [#allocation3], 128  }
  0x55   :  { %1744 = vsyncadd [#allocation3], 4294967168 }
  0x56   :  { %1745 = dma.done.wait [#allocation6], 384  }
  0x57   :  { %1746 = vsyncadd [#allocation6], 4294966912 }
  0x58   :  { %1747 = dma.done.wait [#allocation9], 512  }
  0x59   :  { %1748 = vsyncadd [#allocation9], 4294966784  ;;  %v1758_v0 = vmov 0.0   ;;  %vm1759_vm0 = vmmov 0   ;;  %v1569_v1 = vld [vmem:[#allocation8] sm:$0xff]   ;;  %v1570_v2 = vld [vmem:[#allocation8 + $0x8] sm:$0xff]  }
  0x5a   :  { %1432 = vmatprep.subr.bf16.mxu1 %v1758_v0  ;;  %1424 = vmatprep.subr.bf16.mxu0 %v1758_v0  ;;  %v1571_v3 = vld [vmem:[#allocation7] sm:$0xff]   ;;  %v1573_v4 = vld [vmem:[#allocation7 + $0x8] sm:$0xff]   ;;  %v1572_v5 = vld [vmem:[#allocation5] sm:$0xff]   ;;  %vm158_vm1 = vcmask 261120   ;;  %vm349_vm2 = vcmask 64512   ;;  %vm469_vm3 = vcmask 1043456  }
  0x5b   :  { %1436 = vmatprep.mubr.msk.bf16.mxu1 %vm1759_vm0, %v1758_v0  ;;  %1428 = vmatprep.mubr.msk.bf16.mxu0 %vm1759_vm0, %v1758_v0  ;;  %v1574_v6 = vld [vmem:[#allocation2] sm:$0xff]   ;;  %v1575_v7 = vld [vmem:[#allocation10] sm:$0xff]   ;;  %v1576_v8 = vld [vmem:[#allocation10 + $0x8] sm:$0xff]   ;;  %s1762_s17 = smov 104   ;;  %s1763_s18 = smov 8   ;;  %vm1235_vm4 = vcmask 130048  }
  0x5c   :  { %1433 = vmatpush3.bf16.msra.mxu1 %v1569_v1  ;;  %1425 = vmatpush3.bf16.msra.mxu0 %v1571_v3  ;;  %v1339_v9 = vld [vmem:[%s2140_s7] ss:$0 sm:$0xff]  ;;  %s1760_s7 = smov 120   ;;  %s1764_s1 = smov 16   ;;  %vm1238_vm5 = vcmask 195584  }
  0x5d   :  { %1434 = vmatprep.subr.bf16.mxu1 %v1758_v0  ;;  %1426 = vmatprep.subr.bf16.mxu0 %v1758_v0  ;;  %v1334_v14 = vld [vmem:[%s2139_s6] ss:$0 sm:$0xff]  ;;  %s1765_s20 = smov 24   ;;  %s1766_s24 = smov [#allocation11]  }
  0x5e   :  { %v1344_v33 = vld [vmem:[%s2141_s8] ss:$0 sm:$0xff]  ;;  %s1761_s8 = smov 112   ;;  %s1320_s27 = sshll.u32 %s1766_s24, 4  ;;  %s1321_s27 = int_to_ptr.vmem [resolvable:$true] %s1320_s27 }
  0x5f   :  { %s1721_s28 = scalar_lea.vmem %s1321_s27, 256  ;;  %p1726_p13 = scmp.lt.s32.totalorder %s1321_s27, %s1321_s27 }
  0x60   :  { %1435 = vmatpush3.bf16.msra.mxu1 %v1570_v2  ;;  %1427 = vmatpush3.bf16.msra.mxu0 %v1573_v4  ;;  %p1722_p12 = scmp.ne.s32.totalorder %s1321_s27, %s1721_s28  ;;  %p1727_p0 = scmp.lt.s32.totalorder %s1721_s28, %s1721_s28 }
  0x61   :  { %1448 = vmatprep.subr.bf16.mxu1 %v1758_v0  ;;  %1440 = vmatprep.subr.bf16.mxu0 %v1758_v0 }
  0x62   :  { %p1728_p1 = por %p1727_p0, %p1726_p13 }
  0x63   :  { %1437 = vmatmul.mubr.msk.bf16.vlgmr.msra.gmra.mrb[0].mxu1 %vm158_vm1, %v1572_v5  ;;  %1429 = vmatmul.mubr.msk.bf16.vlgmr.msra.gmra.mrb[0].mxu0 %vm158_vm1, %v1574_v6 }
  0x64   :  { %1450 = vmatprep.mubr.msk.bf16.mxu1 %vm1759_vm0, %v1758_v0  ;;  %1441 = vmatpush3.bf16.msra.mxu0 %v1575_v7  ;;  %p1729_p2 = pnand %p1728_p1, %p1722_p12 }
  0x65   :  { %1444 = vmatprep.mubr.msk.bf16.mxu0 %vm1759_vm0, %v1758_v0  ;;  %1442 = vmatprep.subr.bf16.mxu0 %v1758_v0 }
  0x68   :  { %1443 = vmatpush3.bf16.msra.mxu0 %v1576_v8 }
  0x69   :  { %1454 = vmatprep.subr.bf16.mxu0 %v1758_v0 }
  0x6b   :  { %1445 = vmatmul.mubr.msk.bf16.vlgmr.msra.gmra.mrb[4].mxu0 %vm158_vm1, %v1572_v5 }
  0x6c   :  { %1456 = vmatprep.mubr.msk.bf16.mxu0 %vm1759_vm0, %v1758_v0 }
 0x136   :  { %v265_v10 = vpop.f32.mrb[0].mxu1  ;;  %v196_v15 = vpop.f32.mrb[0].mxu0 }
 0x137   :  { %v266_v11 = vadd.f32 %v1339_v9, %v265_v10  ;;  %v1438_v12 = vpop.f32.mrb[1].mxu1  ;;  %v1430_v19 = vpop.f32.mrb[1].mxu0  ;;  %v197_v22 = vadd.f32 %v1334_v14, %v196_v15 }
 0x138   :  { %v268_v13 = vpop.f32.mrb[2].mxu1  ;;  %v199_v20 = vpop.f32.mrb[2].mxu0 }
 0x139   :  { %v1939_v16 = vpack.c.bf16 %v266_v11, %v266_v11  ;;  %v269_v17 = vadd.f32 %v1339_v9, %v268_v13  ;;  %v1439_v18 = vpop.f32.mrb[3].mxu1  ;;  %v1431_v24 = vpop.f32.mrb[3].mxu0  ;;  %v1950_v26 = vpack.c.bf16 %v197_v22, %v197_v22  ;;  %v200_v27 = vadd.f32 %v1334_v14, %v199_v20 }
 0x13b   :  { %v1941_v21 = vpack.c.bf16 %v269_v17, %v269_v17  ;;  %v354_v23 = vsel %vm349_vm2, %v1939_v16, 0  ;;  %v1953_v31 = vpack.c.bf16 %v200_v27, %v200_v27 }
 0x13c   :  { %1449 = vmatpush3.bf16.xpose.msra.mxu1 %v354_v23 }
 0x13d   :  { %612 = vrot.lane.b32.xlu1 %v1941_v21, %s1760_s7  ;;  %v400_v25 = vsel %vm349_vm2, %v1941_v21, 0  ;;  %1460 = vmatprep.subr.bf16.mxu1 %v1758_v0 }
 0x13e   :  { %1455 = vmatpush3.bf16.xpose.msra.mxu0 %v400_v25  ;;  %v326_v28 = vpop.f32.mrb[4].mxu0 }
 0x13f   :  { %1466 = vmatprep.subr.bf16.mxu0 %v1758_v0  ;;  %v1446_v29 = vpop.f32.mrb[5].mxu0  ;;  %v327_v34 = vadd.f32 %v1344_v33, %v326_v28 }
 0x140   :  { %v329_v30 = vpop.f32.mrb[6].mxu0 }
 0x141   :  { %v1447_v32 = vpop.f32.mrb[7].mxu0  ;;  %v330_v35 = vadd.f32 %v1344_v33, %v329_v30  ;;  %v1966_v36 = vpack.c.bf16 %v327_v34, %v327_v34 }
 0x143   :  { %1451 = vmatmul.mubr.msk.bf16.vlgmr.msra.gmra.mrb[4].mxu1 %vm349_vm2, %v1950_v26  ;;  %v1968_v37 = vpack.c.bf16 %v330_v35, %v330_v35  ;;  %v471_v38 = vsel %vm469_vm3, %v1966_v36, 0 }
 0x144   :  { %1462 = vmatprep.mubr.msk.bf16.mxu1 %vm1759_vm0, %v1758_v0  ;;  %1461 = vmatpush3.bf16.msra.mxu1 %v471_v38 }
 0x145   :  { %1457 = vmatmul.mubr.msk.bf16.vlgmr.msra.gmra.mrb[8].mxu0 %vm349_vm2, %v1953_v31  ;;  %v517_v39 = vsel %vm469_vm3, %v1968_v37, 0  ;;  %1472 = vmatprep.subr.bf16.mxu1 %v1758_v0 }
 0x146   :  { %1468 = vmatprep.mubr.msk.bf16.mxu0 %vm1759_vm0, %v1758_v0  ;;  %1467 = vmatpush3.bf16.msra.mxu0 %v517_v39 }
 0x147   :  { %1478 = vmatprep.subr.bf16.mxu0 %v1758_v0 }
 0x1af   :  { %v613_v60 = vpop.permute.xlu1 %612 }
 0x1b0   :  { %v618_v8 = vsel %vm349_vm2, %v613_v60, 0 }
 0x216   :  { %v390_v40 = vpop.f32.mrb[4].mxu1 }
 0x217   :  { %v1452_v41 = vpop.f32.mrb[5].mxu1  ;;  %v442_v42 = vsel %vm349_vm2, %v390_v40, -inf }
 0x218   :  { %443 = vmax.xlane.f32.xlu0 %v442_v42  ;;  %v393_v43 = vpop.f32.mrb[6].mxu1  ;;  %v436_v44 = vpop.f32.mrb[8].mxu0 }
 0x219   :  { %v1453_v45 = vpop.f32.mrb[7].mxu1  ;;  %v1458_v46 = vpop.f32.mrb[9].mxu0  ;;  %v445_v49 = vsel %vm349_vm2, %v436_v44, -inf }
 0x21a   :  { %v439_v47 = vpop.f32.mrb[10].mxu0 }
 0x21b   :  { %v1459_v48 = vpop.f32.mrb[11].mxu0 }
 0x21c   :  { %446 = vmax.xlane.f32.xlu0 %v445_v49 }
 0x232   :  { %562 = vrot.lane.b32.xlu0 %v1939_v16, %s1760_s7 }
 0x2a5   :  { %v444_v50 = vpop.xlane.xlu0 %443 }
 0x2a6   :  { %v448_v51 = vsub.f32 %v390_v40, %v444_v50 }
 0x2a8   :  { %v450_v52 = vmul.f32 1.442695, %v448_v51 }
 0x2a9   :  { %v447_v53 = vpop.xlane.xlu0 %446 }
 0x2aa   :  { %1579 = vpow2.f32 %v450_v52  ;;  %v449_v54 = vsub.f32 %v436_v44, %v447_v53 }
 0x2ac   :  { %v452_v55 = vmul.f32 1.442695, %v449_v54 }
 0x2ad   :  { %v563_v2 = vpop.permute.xlu0 %562 }
 0x2ae   :  { %1581 = vpow2.f32 %v452_v55  ;;  %v568_v5 = vsel %vm349_vm2, %v563_v2, 0 }
 0x2b4   :  { %v1580_v56 = vpop.eup %1579 }
 0x2b5   :  { %v454_v57 = vsel %vm349_vm2, %v1580_v56, 0.0 }
 0x2b6   :  { %455 = vadd.xlane.f32.xlu1 %v454_v57 }
 0x2b8   :  { %v1582_v58 = vpop.eup %1581 }
 0x2b9   :  { %v457_v59 = vsel %vm349_vm2, %v1582_v58, 0.0 }
 0x2ba   :  { %458 = vadd.xlane.f32.xlu1 %v457_v59 }
 0x2cb   :  { %560 = vrot.lane.b32.xlu1 %v1950_v26, %s1760_s7 }
 0x2cf   :  { %610 = vrot.lane.b32.xlu1 %v1953_v31, %s1760_s7 }
 0x343   :  { %v456_v61 = vpop.xlane.xlu1 %455 }
 0x344   :  { %1583 = vrcp.f32 %v456_v61 }
 0x347   :  { %v459_v62 = vpop.xlane.xlu1 %458 }
 0x348   :  { %1585 = vrcp.f32 %v459_v62 }
 0x34b   :  { %v561_v9 = vpop.permute.xlu1 %560 }
 0x34e   :  { %v1584_v63 = vpop.eup %1583 }
 0x34f   :  { %v462_v1 = vmul.f32 %v1584_v63, %v1580_v56  ;;  %v611_v10 = vpop.permute.xlu1 %610 }
 0x351   :  { %v464_v3 = vpack.c.bf16 %v462_v1, %v462_v1 }
 0x352   :  { %v1586_v4 = vpop.eup %1585 }
 0x353   :  { %v463_v6 = vmul.f32 %v1586_v4, %v1582_v58  ;;  %1463 = vmatmul.mubr.msk.bf16.vlgmr.msra.gmra.mrb[8].mxu1 %vm349_vm2, %v464_v3 }
 0x354   :  { %1473 = vmatpush3.bf16.xpose.msra.mxu1 %v568_v5  ;;  %1474 = vmatprep.mubr.msk.bf16.mxu1 %vm1759_vm0, %v1758_v0 }
 0x355   :  { %v465_v7 = vpack.c.bf16 %v463_v6, %v463_v6  ;;  %1484 = vmatprep.subr.bf16.mxu1 %v1758_v0 }
 0x357   :  { %1469 = vmatmul.mubr.msk.bf16.vlgmr.msra.gmra.mrb[12].mxu0 %vm349_vm2, %v465_v7 }
 0x358   :  { %1479 = vmatpush3.bf16.xpose.msra.mxu0 %v618_v8  ;;  %1480 = vmatprep.mubr.msk.bf16.mxu0 %vm1759_vm0, %v1758_v0 }
 0x359   :  { %1490 = vmatprep.subr.bf16.mxu0 %v1758_v0 }
 0x35b   :  { %1475 = vmatmul.mubr.msk.bf16.vlgmr.msra.gmra.mrb[12].mxu1 %vm349_vm2, %v561_v9 }
 0x35c   :  { %1486 = vmatprep.mubr.msk.bf16.mxu1 %vm1759_vm0, %v1758_v0 }
 0x35f   :  { %1481 = vmatmul.mubr.msk.bf16.vlgmr.msra.gmra.mrb[16].mxu0 %vm349_vm2, %v611_v10 }
 0x360   :  { %1492 = vmatprep.mubr.msk.bf16.mxu0 %vm1759_vm0, %v1758_v0 }
 0x426   :  { %v2002_v11 = vpop.f32.mrb[8].mxu1 }
 0x427   :  { %v1464_v12 = vpop.f32.mrb[9].mxu1 }
 0x428   :  { %v510_v13 = vpop.f32.mrb[10].mxu1 }
 0x429   :  { %v1465_v14 = vpop.f32.mrb[11].mxu1 }
 0x42a   :  { %v2004_v15 = vpop.f32.mrb[12].mxu0 }
 0x42b   :  { %v559_v17 = vpack.c.bf16 %v2004_v15, %v2002_v11  ;;  %v1470_v18 = vpop.f32.mrb[13].mxu0 }
 0x42c   :  { %v556_v19 = vpop.f32.mrb[14].mxu0 }
 0x42d   :  { %v1471_v20 = vpop.f32.mrb[15].mxu0 }
 0x42e   :  { %v604_v22 = vpop.f32.mrb[12].mxu1 }
 0x42f   :  { %v1476_v23 = vpop.f32.mrb[13].mxu1  ;;  %v660_v24 = vsel %vm349_vm2, %v604_v22, -inf }
 0x430   :  { %661 = vmax.xlane.f32.xlu0 %v660_v24  ;;  %v607_v25 = vpop.f32.mrb[14].mxu1 }
 0x431   :  { %v1477_v27 = vpop.f32.mrb[15].mxu1 }
 0x432   :  { %v654_v28 = vpop.f32.mrb[16].mxu0 }
 0x433   :  { %v1482_v29 = vpop.f32.mrb[17].mxu0  ;;  %v663_v30 = vsel %vm349_vm2, %v654_v28, -inf }
 0x434   :  { %664 = vmax.xlane.f32.xlu1 %v663_v30  ;;  %v657_v32 = vpop.f32.mrb[18].mxu0 }
 0x435   :  { %v1483_v33 = vpop.f32.mrb[19].mxu0 }
 0x445   :  { %732 = vrot.lane.b32.xlu1 %v1968_v37, %s1760_s7 }
 0x449   :  { %783 = vrot.lane.b32.xlu1 %v1939_v16, %s1761_s8 }
 0x44d   :  { %833 = vrot.lane.b32.xlu1 %v1941_v21, %s1761_s8 }
 0x451   :  { %831 = vrot.lane.b32.xlu1 %v1953_v31, %s1761_s8 }
 0x4bd   :  { %v662_v34 = vpop.xlane.xlu0 %661 }
 0x4be   :  { %v666_v35 = vsub.f32 %v604_v22, %v662_v34 }
 0x4c0   :  { %v668_v38 = vmul.f32 1.442695, %v666_v35 }
 0x4c1   :  { %v665_v39 = vpop.xlane.xlu1 %664 }
 0x4c2   :  { %1587 = vpow2.f32 %v668_v38  ;;  %v667_v40 = vsub.f32 %v654_v28, %v665_v39 }
 0x4c4   :  { %v670_v41 = vmul.f32 1.442695, %v667_v40 }
 0x4c5   :  { %v733_v42 = vpop.permute.xlu1 %732 }
 0x4c6   :  { %1589 = vpow2.f32 %v670_v41  ;;  %v738_v43 = vsel %vm469_vm3, %v733_v42, 0 }
 0x4c7   :  { %1491 = vmatpush3.bf16.msra.mxu0 %v738_v43 }
 0x4c8   :  { %1502 = vmatprep.subr.bf16.mxu0 %v1758_v0 }
 0x4c9   :  { %v784_v53 = vpop.permute.xlu1 %783 }
 0x4ca   :  { %v789_v59 = vsel %vm349_vm2, %v784_v53, 0 }
 0x4cc   :  { %v1588_v44 = vpop.eup %1587 }
 0x4cd   :  { %v672_v45 = vsel %vm349_vm2, %v1588_v44, 0.0  ;;  %v834_v58 = vpop.permute.xlu1 %833 }
 0x4ce   :  { %673 = vadd.xlane.f32.xlu0 %v672_v45  ;;  %v839_v61 = vsel %vm349_vm2, %v834_v58, 0 }
 0x4d0   :  { %v1590_v46 = vpop.eup %1589 }
 0x4d1   :  { %v675_v47 = vsel %vm349_vm2, %v1590_v46, 0.0  ;;  %v832_v63 = vpop.permute.xlu1 %831 }
 0x4d2   :  { %676 = vadd.xlane.f32.xlu0 %v675_v47 }
 0x4e8   :  { %684 = vrot.lane.b32.xlu0 %v1966_v36, %s1760_s7 }
 0x4ec   :  { %781 = vrot.lane.b32.xlu0 %v1950_v26, %s1761_s8 }
 0x55b   :  { %v674_v48 = vpop.xlane.xlu0 %673 }
 0x55c   :  { %1591 = vrcp.f32 %v674_v48 }
 0x55f   :  { %v677_v49 = vpop.xlane.xlu0 %676 }
 0x560   :  { %1593 = vrcp.f32 %v677_v49 }
 0x563   :  { %v685_v50 = vpop.permute.xlu0 %684 }
 0x564   :  { %v690_v51 = vsel %vm469_vm3, %v685_v50, 0 }
 0x565   :  { %1485 = vmatpush3.bf16.msra.mxu1 %v690_v51 }
 0x566   :  { %v1592_v52 = vpop.eup %1591  ;;  %1496 = vmatprep.subr.bf16.mxu1 %v1758_v0 }
 0x567   :  { %v680_v54 = vmul.f32 %v1592_v52, %v1588_v44  ;;  %v782_v62 = vpop.permute.xlu0 %781 }
 0x569   :  { %v682_v55 = vpack.c.bf16 %v680_v54, %v680_v54 }
 0x56a   :  { %v1594_v56 = vpop.eup %1593 }
 0x56b   :  { %v681_v57 = vmul.f32 %v1594_v56, %v1590_v46  ;;  %1487 = vmatmul.mubr.msk.bf16.vlgmr.msra.gmra.mrb[16].mxu1 %vm349_vm2, %v682_v55 }
 0x56c   :  { %1498 = vmatprep.mubr.msk.bf16.mxu1 %vm1759_vm0, %v1758_v0 }
 0x56d   :  { %v683_v60 = vpack.c.bf16 %v681_v57, %v681_v57 }
 0x56e   :  { %1497 = vmatpush3.bf16.xpose.msra.mxu1 %v789_v59 }
 0x56f   :  { %1493 = vmatmul.mubr.msk.bf16.vlgmr.msra.gmra.mrb[20].mxu0 %vm349_vm2, %v683_v60  ;;  %1508 = vmatprep.subr.bf16.mxu1 %v1758_v0 }
 0x570   :  { %1503 = vmatpush3.bf16.xpose.msra.mxu0 %v839_v61  ;;  %1504 = vmatprep.mubr.msk.bf16.mxu0 %vm1759_vm0, %v1758_v0 }
 0x571   :  { %1514 = vmatprep.subr.bf16.mxu0 %v1758_v0 }
 0x575   :  { %1499 = vmatmul.mubr.msk.bf16.vlgmr.msra.gmra.mrb[20].mxu1 %vm349_vm2, %v782_v62 }
 0x576   :  { %1510 = vmatprep.mubr.msk.bf16.mxu1 %vm1759_vm0, %v1758_v0 }
 0x577   :  { %1505 = vmatmul.mubr.msk.bf16.vlgmr.msra.gmra.mrb[24].mxu0 %vm349_vm2, %v832_v63 }
 0x578   :  { %1516 = vmatprep.mubr.msk.bf16.mxu0 %vm1759_vm0, %v1758_v0 }
 0x63e   :  { %v2044_v1 = vpop.f32.mrb[16].mxu1 }
 0x63f   :  { %v1488_v2 = vpop.f32.mrb[17].mxu1 }
 0x640   :  { %v729_v3 = vpop.f32.mrb[18].mxu1 }
 0x641   :  { %v1489_v4 = vpop.f32.mrb[19].mxu1 }
 0x642   :  { %v2046_v5 = vpop.f32.mrb[20].mxu0 }
 0x643   :  { %v780_v6 = vpack.c.bf16 %v2046_v5, %v2044_v1  ;;  %v1494_v7 = vpop.f32.mrb[21].mxu0 }
 0x644   :  { %v777_v8 = vpop.f32.mrb[22].mxu0 }
 0x645   :  { %v1495_v9 = vpop.f32.mrb[23].mxu0 }
 0x648   :  { %v825_v10 = vpop.f32.mrb[20].mxu1 }
 0x649   :  { %v1500_v12 = vpop.f32.mrb[21].mxu1  ;;  %v881_v13 = vsel %vm349_vm2, %v825_v10, -inf }
 0x64a   :  { %882 = vmax.xlane.f32.xlu0 %v881_v13  ;;  %v828_v14 = vpop.f32.mrb[22].mxu1  ;;  %v875_v18 = vpop.f32.mrb[24].mxu0 }
 0x64b   :  { %v1501_v19 = vpop.f32.mrb[23].mxu1  ;;  %v1506_v20 = vpop.f32.mrb[25].mxu0  ;;  %v884_v22 = vsel %vm349_vm2, %v875_v18, -inf }
 0x64c   :  { %885 = vmax.xlane.f32.xlu1 %v884_v22  ;;  %v878_v23 = vpop.f32.mrb[26].mxu0 }
 0x64d   :  { %v1507_v24 = vpop.f32.mrb[27].mxu0 }
 0x65d   :  { %953 = vrot.lane.b32.xlu1 %v1968_v37, %s1761_s8 }
 0x661   :  { %1004 = vrot.lane.b32.xlu1 %v1939_v16, %s1762_s17 }
 0x665   :  { %1054 = vrot.lane.b32.xlu1 %v1941_v21, %s1762_s17 }
 0x669   :  { %1052 = vrot.lane.b32.xlu1 %v1953_v31, %s1762_s17 }
 0x6d7   :  { %v883_v25 = vpop.xlane.xlu0 %882 }
 0x6d8   :  { %v887_v27 = vsub.f32 %v825_v10, %v883_v25 }
 0x6d9   :  { %v886_v28 = vpop.xlane.xlu1 %885 }
 0x6da   :  { %v889_v29 = vmul.f32 1.442695, %v887_v27  ;;  %v888_v30 = vsub.f32 %v875_v18, %v886_v28 }
 0x6dc   :  { %1595 = vpow2.f32 %v889_v29  ;;  %v891_v32 = vmul.f32 1.442695, %v888_v30 }
 0x6dd   :  { %v954_v33 = vpop.permute.xlu1 %953 }
 0x6de   :  { %1597 = vpow2.f32 %v891_v32  ;;  %v959_v34 = vsel %vm469_vm3, %v954_v33, 0 }
 0x6df   :  { %1515 = vmatpush3.bf16.msra.mxu0 %v959_v34 }
 0x6e0   :  { %1526 = vmatprep.subr.bf16.mxu0 %v1758_v0 }
 0x6e1   :  { %v1005_v43 = vpop.permute.xlu1 %1004 }
 0x6e5   :  { %v1055_v48 = vpop.permute.xlu1 %1054 }
 0x6e6   :  { %v1596_v16 = vpop.eup %1595  ;;  %v1060_v50 = vsel %vm349_vm2, %v1055_v48, 0 }
 0x6e7   :  { %v893_v21 = vsel %vm349_vm2, %v1596_v16, 0.0 }
 0x6e8   :  { %v1598_v35 = vpop.eup %1597  ;;  %894 = vadd.xlane.f32.xlu0 %v893_v21  ;;  %v1577_v21 = vld [vmem:[%s2138_s5] sm:$0xff]  }
 0x6e9   :  { %v896_v31 = vsel %vm349_vm2, %v1598_v35, 0.0  ;;  %v1053_v52 = vpop.permute.xlu1 %1052 }
 0x6ec   :  { %897 = vadd.xlane.f32.xlu0 %v896_v31 }
 0x702   :  { %905 = vrot.lane.b32.xlu0 %v1966_v36, %s1761_s8 }
 0x706   :  { %1002 = vrot.lane.b32.xlu0 %v1950_v26, %s1762_s17  ;;  %v1010_v26 = vsel %vm349_vm2, %v1005_v43, 0 }
 0x775   :  { %v895_v38 = vpop.xlane.xlu0 %894 }
 0x776   :  { %1599 = vrcp.f32 %v895_v38 }
 0x779   :  { %v898_v39 = vpop.xlane.xlu0 %897 }
 0x77a   :  { %1601 = vrcp.f32 %v898_v39 }
 0x77d   :  { %v906_v40 = vpop.permute.xlu0 %905 }
 0x77e   :  { %v911_v41 = vsel %vm469_vm3, %v906_v40, 0 }
 0x77f   :  { %1509 = vmatpush3.bf16.msra.mxu1 %v911_v41 }
 0x780   :  { %v1600_v42 = vpop.eup %1599  ;;  %1520 = vmatprep.subr.bf16.mxu1 %v1758_v0 }
 0x781   :  { %v901_v44 = vmul.f32 %v1600_v42, %v1596_v16  ;;  %v1003_v51 = vpop.permute.xlu0 %1002 }
 0x783   :  { %v903_v45 = vpack.c.bf16 %v901_v44, %v901_v44 }
 0x784   :  { %v1602_v46 = vpop.eup %1601 }
 0x785   :  { %v902_v47 = vmul.f32 %v1602_v46, %v1598_v35  ;;  %1511 = vmatmul.mubr.msk.bf16.vlgmr.msra.gmra.mrb[24].mxu1 %vm349_vm2, %v903_v45  ;;  %v1578_v35 = vld [vmem:[%s2138_s5 + $0x8] sm:$0xff]  }
 0x786   :  { %1522 = vmatprep.mubr.msk.bf16.mxu1 %vm1759_vm0, %v1758_v0 }
 0x787   :  { %v904_v49 = vpack.c.bf16 %v902_v47, %v902_v47 }
 0x788   :  { %1521 = vmatpush3.bf16.xpose.msra.mxu1 %v1010_v26 }
 0x789   :  { %1517 = vmatmul.mubr.msk.bf16.vlgmr.msra.gmra.mrb[28].mxu0 %vm349_vm2, %v904_v49  ;;  %1532 = vmatprep.subr.bf16.mxu1 %v1758_v0 }
 0x78a   :  { %1527 = vmatpush3.bf16.xpose.msra.mxu0 %v1060_v50  ;;  %1528 = vmatprep.mubr.msk.bf16.mxu0 %vm1759_vm0, %v1758_v0  ;;  %v1373_v50 = vld [vmem:[%s2142_s9] ss:$0 sm:$0xff] }
 0x78b   :  { %1538 = vmatprep.subr.bf16.mxu0 %v1758_v0 }
 0x78f   :  { %1523 = vmatmul.mubr.msk.bf16.vlgmr.msra.gmra.mrb[28].mxu1 %vm349_vm2, %v1003_v51 }
 0x790   :  { %1534 = vmatprep.mubr.msk.bf16.mxu1 %vm1759_vm0, %v1758_v0 }
 0x791   :  { %1529 = vmatmul.mubr.msk.bf16.vlgmr.msra.gmra.mrb[32].mxu0 %vm349_vm2, %v1053_v52 }
 0x792   :  { %1540 = vmatprep.mubr.msk.bf16.mxu0 %vm1759_vm0, %v1758_v0 }
 0x858   :  { %v947_v53 = vpop.f32.mrb[24].mxu1 }
 0x859   :  { %v1512_v54 = vpop.f32.mrb[25].mxu1 }
 0x85a   :  { %v950_v55 = vpop.f32.mrb[26].mxu1 }
 0x85b   :  { %v1513_v56 = vpop.f32.mrb[27].mxu1 }
 0x85c   :  { %v995_v57 = vpop.f32.mrb[28].mxu0 }
 0x85d   :  { %v1001_v58 = vpack.c.bf16 %v995_v57, %v947_v53  ;;  %v1518_v59 = vpop.f32.mrb[29].mxu0 }
 0x85e   :  { %v998_v60 = vpop.f32.mrb[30].mxu0 }
 0x85f   :  { %v1519_v61 = vpop.f32.mrb[31].mxu0 }
 0x862   :  { %v1046_v62 = vpop.f32.mrb[28].mxu1 }
 0x863   :  { %v1524_v63 = vpop.f32.mrb[29].mxu1  ;;  %v1102_v2 = vsel %vm349_vm2, %v1046_v62, -inf }
 0x864   :  { %1103 = vmax.xlane.f32.xlu0 %v1102_v2  ;;  %v1049_v3 = vpop.f32.mrb[30].mxu1  ;;  %v1096_v4 = vpop.f32.mrb[32].mxu0 }
 0x865   :  { %v1525_v7 = vpop.f32.mrb[31].mxu1  ;;  %v1530_v8 = vpop.f32.mrb[33].mxu0  ;;  %v1105_v9 = vsel %vm349_vm2, %v1096_v4, -inf }
 0x866   :  { %1106 = vmax.xlane.f32.xlu1 %v1105_v9  ;;  %v1099_v10 = vpop.f32.mrb[34].mxu0 }
 0x867   :  { %v1531_v12 = vpop.f32.mrb[35].mxu0 }
 0x877   :  { %1174 = vrot.lane.b32.xlu1 %v1968_v37, %s1762_s17 }
 0x87b   :  { %1224 = vrot.lane.b32.xlu1 %v780_v6, %s1763_s18 }
 0x87f   :  { %1227 = vrot.lane.b32.xlu1 %v1001_v58, %s1764_s1 }
 0x8f1   :  { %v1104_v13 = vpop.xlane.xlu0 %1103 }
 0x8f2   :  { %v1108_v14 = vsub.f32 %v1046_v62, %v1104_v13 }
 0x8f3   :  { %v1107_v18 = vpop.xlane.xlu1 %1106 }
 0x8f4   :  { %v1110_v19 = vmul.f32 1.442695, %v1108_v14  ;;  %v1109_v20 = vsub.f32 %v1096_v4, %v1107_v18 }
 0x8f6   :  { %1603 = vpow2.f32 %v1110_v19  ;;  %v1112_v22 = vmul.f32 1.442695, %v1109_v20 }
 0x8f7   :  { %v1175_v23 = vpop.permute.xlu1 %1174 }
 0x8f8   :  { %1605 = vpow2.f32 %v1112_v22  ;;  %v1180_v24 = vsel %vm469_vm3, %v1175_v23, 0 }
 0x8f9   :  { %1539 = vmatpush3.bf16.msra.mxu0 %v1180_v24 }
 0x8fb   :  { %v1225_v46 = vpop.permute.xlu1 %1224 }
 0x8ff   :  { %v1228_v47 = vpop.permute.xlu1 %1227 }
 0x900   :  { %v1604_v37 = vpop.eup %1603 }
 0x901   :  { %v1114_v25 = vsel %vm349_vm2, %v1604_v37, 0.0 }
 0x902   :  { %v1606_v27 = vpop.eup %1605  ;;  %1115 = vadd.xlane.f32.xlu0 %v1114_v25 }
 0x903   :  { %v1117_v1 = vsel %vm349_vm2, %v1606_v27, 0.0 }
 0x906   :  { %1118 = vadd.xlane.f32.xlu0 %v1117_v1 }
 0x91c   :  { %1126 = vrot.lane.b32.xlu0 %v1966_v36, %s1762_s17 }
 0x98f   :  { %v1116_v5 = vpop.xlane.xlu0 %1115 }
 0x990   :  { %1607 = vrcp.f32 %v1116_v5 }
 0x993   :  { %v1119_v6 = vpop.xlane.xlu0 %1118 }
 0x994   :  { %1609 = vrcp.f32 %v1119_v6 }
 0x997   :  { %v1127_v28 = vpop.permute.xlu0 %1126 }
 0x998   :  { %v1132_v29 = vsel %vm469_vm3, %v1127_v28, 0 }
 0x999   :  { %1533 = vmatpush3.bf16.msra.mxu1 %v1132_v29 }
 0x99a   :  { %v1608_v30 = vpop.eup %1607  ;;  %1544 = vmatprep.subr.bf16.mxu1 %v1758_v0 }
 0x99b   :  { %v1122_v32 = vmul.f32 %v1608_v30, %v1604_v37 }
 0x99d   :  { %v1124_v33 = vpack.c.bf16 %v1122_v32, %v1122_v32 }
 0x99e   :  { %v1610_v34 = vpop.eup %1609 }
 0x99f   :  { %v1123_v16 = vmul.f32 %v1610_v34, %v1606_v27  ;;  %1535 = vmatmul.mubr.msk.bf16.vlgmr.msra.gmra.mrb[32].mxu1 %vm349_vm2, %v1124_v33 }
 0x9a0   :  { %1548 = vmatprep.mubr.msk.bf16.mxu1 %vm1759_vm0, %v1758_v0  ;;  %1545 = vmatpush3.bf16.msra.mxu1 %v1577_v21 }
 0x9a1   :  { %v1125_v36 = vpack.c.bf16 %v1123_v16, %v1123_v16  ;;  %1546 = vmatprep.subr.bf16.mxu1 %v1758_v0  ;;  %v1234_v0 = vsel %vm349_vm2, %v559_v17, %v1225_v46 }
 0x9a2   :  { %v1237_v48 = vsel %vm1235_vm4, %v1234_v0, %v1228_v47 }
 0x9a3   :  { %1541 = vmatmul.mubr.msk.bf16.vlgmr.msra.gmra.mrb[36].mxu0 %vm349_vm2, %v1125_v36 }
 0x9a4   :  { %1547 = vmatpush3.bf16.msra.mxu1 %v1578_v35 }
 0xa72   :  { %v1168_v31 = vpop.f32.mrb[32].mxu1 }
 0xa73   :  { %v1536_v38 = vpop.f32.mrb[33].mxu1 }
 0xa74   :  { %v1171_v39 = vpop.f32.mrb[34].mxu1 }
 0xa75   :  { %v1537_v40 = vpop.f32.mrb[35].mxu1 }
 0xa76   :  { %v1216_v41 = vpop.f32.mrb[36].mxu0 }
 0xa77   :  { %v1222_v42 = vpack.c.bf16 %v1216_v41, %v1168_v31  ;;  %v1542_v43 = vpop.f32.mrb[37].mxu0 }
 0xa78   :  { %v1219_v44 = vpop.f32.mrb[38].mxu0 }
 0xa79   :  { %1230 = vrot.lane.b32.xlu0 %v1222_v42, %s1765_s20  ;;  %v1543_v45 = vpop.f32.mrb[39].mxu0 }
 0xaeb   :  { %v1231_v26 = vpop.permute.xlu0 %1230 }
 0xaec   :  { %v1240_v49 = vsel %vm1238_vm5, %v1237_v48, %v1231_v26 }
 0xaed   :  { %1549 = vmatmul.mubr.msk.bf16.vlgmr.msra.gmra.mrb[36].mxu1 %vm158_vm1, %v1240_v49 }
 0xbc0   :  { %v1289_v51 = vpop.f32.mrb[36].mxu1 }
 0xbc1   :  { %v1311_v52 = vadd.f32 %v1373_v50, %v1289_v51  ;;  %v1550_v53 = vpop.f32.mrb[37].mxu1 }
 0xbc2   :  { %v1292_v54 = vpop.f32.mrb[38].mxu1 }
 0xbc3   :  { %1313 = vst [vmem:[#allocation11] sm:$0xff] %v1311_v52  ;;  %v1312_v55 = vadd.f32 %v1373_v50, %v1292_v54  ;;  %v1551_v11 = vpop.f32.mrb[39].mxu1 }
 0xbc5   :  { %1314 = vst [vmem:[#allocation11 + $0x8] sm:$0xff] %v1312_v55 }
 0xbc6   :  { %1732 = shalt.err (!%p1729_p2)
}
 0xbc7   :  { %s1733_s30 = scalar_lea.hbm %s2143_s10, 256 }
 0xbc8   :  { %p1734_p3 = scmp.ne.s32.totalorder %s2143_s10, %s1733_s30  ;;  %p1737_p4 = scmp.lt.u32.totalorder %s1733_s30, %s2143_s10 }
 0xbca   :  { %p1739_p5 = pnand %p1737_p4, %p1734_p3 }
 0xbcc   :  { %1742 = shalt.err (!%p1739_p5)
}
 0xbcd   :  { %s1767_s2 = smov 128  }
 0xbce   :  { %1326 = dma.vmem_to_hbm [thread:$0]  %s1321_s27, 256, %s2143_s10, [#allocation4], %s1767_s2, %s1767_s2, %s1763_s18  }
 0xbcf   :  { %1749 = dma.done.wait [#allocation4], 256  }
 0xbd0   :  { %1750 = vsyncadd [#allocation4], 4294967040 }
 0xbd1   :  { %1330 = vsyncpa [#allocation3], 1 }
 0xbd2   :  { %1331 = vsyncpa [#allocation6], 1 }
 0xbd3   :  { %1332 = vsyncpa [#allocation9], 1 }
 0xbd4   :  { %1333 = vsyncpa [#allocation4], 1 }

</bundles_post_ra>
